<compile_context>
chip_gen: v6e
topology: v6e:2x2x1
jax: 0.10.0
libtpu: 0.0.40
codegen_flags: <defaults>
</compile_context>

<pallas_src>
import jax
import jax.numpy as jnp
from jax.experimental import pallas as pl
from jax.experimental.pallas import tpu as pltpu

LANE = 128      # TPU lane width: pad feature dims to this for lane-dense vregs
SUBLANE = 8     # sublane granularity for the batch (second-to-last) dim


def _round_up(x, m):
    return ((x + m - 1) // m) * m


def _actor_kernel(x_ref, w1_ref, b1_ref, w2_ref, b2_ref, w3_ref, b3_ref, o_ref):
    x = x_ref[...]
    # fc1 + ReLU
    h1 = jnp.dot(x, w1_ref[...], preferred_element_type=jnp.float32) + b1_ref[...]
    h1 = jnp.maximum(h1, 0.0)
    # fc2 + ReLU
    h2 = jnp.dot(h1, w2_ref[...], preferred_element_type=jnp.float32) + b2_ref[...]
    h2 = jnp.maximum(h2, 0.0)
    # fc3 + tanh
    h3 = jnp.dot(h2, w3_ref[...], preferred_element_type=jnp.float32) + b3_ref[...]
    o_ref[...] = jnp.tanh(h3).astype(o_ref.dtype)


def _pad2d(a, rows, cols):
    r, c = a.shape
    return jnp.pad(a, ((0, rows - r), (0, cols - c)))


def actor_forward(state, params, *, max_batch_tile=512):
    """state: (B, state_size) f32; params: dict of (in,out) weights, (1,out) biases."""
    B, S = state.shape
    H = params["w1"].shape[1]
    A = params["w3"].shape[1]

    # Lane-dense padded feature widths.
    Hp = _round_up(max(H, LANE), LANE)
    Ap = _round_up(max(A, LANE), LANE)

    # Zero-pad weights/biases: padded hidden columns yield ReLU(0)=0 and feed
    # zero rows of the next weight; padded action columns are sliced off.
    w1p = _pad2d(params["w1"], S, Hp)
    b1p = _pad2d(params["b1"], 1, Hp)
    w2p = _pad2d(params["w2"], Hp, Hp)
    b2p = _pad2d(params["b2"], 1, Hp)
    w3p = _pad2d(params["w3"], Hp, Ap)
    b3p = _pad2d(params["b3"], 1, Ap)

    # Batch tile: multiple of 8 sublanes, capped so double-buffered tiles stay
    # tiny relative to VMEM (even on v7x's 64 MiB).
    TB = min(max_batch_tile, _round_up(B, SUBLANE))
    Bp = _round_up(B, TB)
    xp = jnp.pad(state, ((0, Bp - B), (0, 0)))

    grid = (Bp // TB,)

    flops = 2 * Bp * (S * Hp + Hp * Hp + Hp * Ap)
    bytes_accessed = (
        Bp * S * 4 + Bp * Ap * 4
        + (S * Hp + Hp + Hp * Hp + Hp + Hp * Ap + Ap) * 4
    )

    out_pad = pl.pallas_call(
        _actor_kernel,
        out_shape=jax.ShapeDtypeStruct((Bp, Ap), jnp.float32),
        grid=grid,
        in_specs=[
            # Streamed activations: one (TB, S) tile per grid step.
            pl.BlockSpec((TB, S), lambda i: (i, 0)),
            # Weights/biases: constant index_map -> resident in VMEM.
            pl.BlockSpec((S, Hp), lambda i: (0, 0)),
            pl.BlockSpec((1, Hp), lambda i: (0, 0)),
            pl.BlockSpec((Hp, Hp), lambda i: (0, 0)),
            pl.BlockSpec((1, Hp), lambda i: (0, 0)),
            pl.BlockSpec((Hp, Ap), lambda i: (0, 0)),
            pl.BlockSpec((1, Ap), lambda i: (0, 0)),
        ],
        # Lane-dense (TB, 128) output tile -> unmasked vector stores.
        out_specs=pl.BlockSpec((TB, Ap), lambda i: (i, 0)),
        compiler_params=pltpu.CompilerParams(
            dimension_semantics=("parallel",),
        ),
        cost_estimate=pl.CostEstimate(
            flops=flops,
            transcendentals=Bp * Ap,
            bytes_accessed=bytes_accessed,
        ),
    )(xp, w1p, b1p, w2p, b2p, w3p, b3p)

    return out_pad[:B, :A]


def init_actor_params(key, state_size, action_size, hidden=32):
    """Deterministic init mimicking nn.Linear's U(-1/sqrt(fan_in), 1/sqrt(fan_in))."""
    def linear(key, fan_in, fan_out):
        kw, kb = jax.random.split(key)
        bound = 1.0 / jnp.sqrt(jnp.float32(fan_in))
        w = jax.random.uniform(kw, (fan_in, fan_out), jnp.float32, -bound, bound)
        b = jax.random.uniform(kb, (1, fan_out), jnp.float32, -bound, bound)
        return w, b

    k1, k2, k3 = jax.random.split(key, 3)
    w1, b1 = linear(k1, state_size, hidden)
    w2, b2 = linear(k2, hidden, hidden)
    w3, b3 = linear(k3, hidden, action_size)
    return {"w1": w1, "b1": b1, "w2": w2, "b2": b2, "w3": w3, "b3": b3}


if __name__ == "__main__":
    key = jax.random.PRNGKey(0)
    k_params, k_state = jax.random.split(key)

    batch = 2
    state_size = 8
    action_size = 4

    params = init_actor_params(k_params, state_size, action_size)
    state = jax.random.normal(k_state, (batch, state_size), jnp.float32)

    out = actor_forward(state, params)
    out = jax.block_until_ready(out)

    # Reference check in plain JAX (same math, unpadded params).
    h1 = jnp.maximum(state @ params["w1"] + params["b1"], 0.0)
    h2 = jnp.maximum(h1 @ params["w2"] + params["b2"], 0.0)
    ref = jnp.tanh(h2 @ params["w3"] + params["b3"])
    assert out.shape == (batch, action_size)
    assert jnp.allclose(out, ref, atol=1e-5), "mismatch vs reference"

    print("KERNEL_OK")
</pallas_src>

<mosaic_0001>
module attributes {stable_mosaic.version = 11 : i64} {
  func.func @_actor_kernel(%arg0: i32, %arg1: memref<8x8xf32, #tpu.memory_space<vmem>>, %arg2: memref<8x128xf32, #tpu.memory_space<vmem>>, %arg3: memref<1x128xf32, #tpu.memory_space<vmem>>, %arg4: memref<128x128xf32, #tpu.memory_space<vmem>>, %arg5: memref<1x128xf32, #tpu.memory_space<vmem>>, %arg6: memref<128x128xf32, #tpu.memory_space<vmem>>, %arg7: memref<1x128xf32, #tpu.memory_space<vmem>>, %arg8: memref<8x128xf32, #tpu.memory_space<vmem>>) attributes {dimension_semantics = [#tpu.dimension_semantics<parallel>], iteration_bounds = array<i64: 1>, scalar_prefetch = 0 : i64, scratch_operands = 0 : i64, tpu.core_type = #tpu.core_type<tc>, window_params = [{transform_indices = @transform_0, window_bounds = array<i64: 8, 8>}, {pipeline_mode = #tpu.pipeline_mode<synchronous>, transform_indices = @transform_1, window_bounds = array<i64: 8, 128>}, {pipeline_mode = #tpu.pipeline_mode<synchronous>, transform_indices = @transform_2, window_bounds = array<i64: 1, 128>}, {pipeline_mode = #tpu.pipeline_mode<synchronous>, transform_indices = @transform_3, window_bounds = array<i64: 128, 128>}, {pipeline_mode = #tpu.pipeline_mode<synchronous>, transform_indices = @transform_4, window_bounds = array<i64: 1, 128>}, {pipeline_mode = #tpu.pipeline_mode<synchronous>, transform_indices = @transform_5, window_bounds = array<i64: 128, 128>}, {pipeline_mode = #tpu.pipeline_mode<synchronous>, transform_indices = @transform_6, window_bounds = array<i64: 1, 128>}, {transform_indices = @transform_7, window_bounds = array<i64: 8, 128>}]} {
    %c0 = arith.constant 0 : index
    %c0_0 = arith.constant 0 : index
    %0 = vector.load %arg1[%c0, %c0_0] : memref<8x8xf32, #tpu.memory_space<vmem>>, vector<8x8xf32>
    %c0_1 = arith.constant 0 : index
    %c0_2 = arith.constant 0 : index
    %1 = vector.load %arg2[%c0_1, %c0_2] : memref<8x128xf32, #tpu.memory_space<vmem>>, vector<8x128xf32>
    %cst = arith.constant dense<0.000000e+00> : vector<8x128xf32>
    %2 = tpu.matmul %0, %1, %cst {dimension_numbers = #tpu.dot_dimension_numbers<[1], [0], [0], [1], [0, 0, 1, 1], [], []>} : vector<8x8xf32>, vector<8x128xf32>, vector<8x128xf32> -> vector<8x128xf32>
    %c0_3 = arith.constant 0 : index
    %c0_4 = arith.constant 0 : index
    %3 = vector.load %arg3[%c0_3, %c0_4] : memref<1x128xf32, #tpu.memory_space<vmem>>, vector<1x128xf32>
    %4 = vector.broadcast %3 : vector<1x128xf32> to vector<8x128xf32>
    %5 = arith.addf %2, %4 : vector<8x128xf32>
    %cst_5 = arith.constant 0.000000e+00 : f32
    %6 = vector.broadcast %cst_5 : f32 to vector<8x128xf32>
    %7 = arith.maximumf %5, %6 : vector<8x128xf32>
    %c0_6 = arith.constant 0 : index
    %c0_7 = arith.constant 0 : index
    %8 = vector.load %arg4[%c0_6, %c0_7] : memref<128x128xf32, #tpu.memory_space<vmem>>, vector<128x128xf32>
    %cst_8 = arith.constant dense<0.000000e+00> : vector<8x128xf32>
    %9 = tpu.matmul %7, %8, %cst_8 {dimension_numbers = #tpu.dot_dimension_numbers<[1], [0], [0], [1], [0, 0, 1, 1], [], []>} : vector<8x128xf32>, vector<128x128xf32>, vector<8x128xf32> -> vector<8x128xf32>
    %c0_9 = arith.constant 0 : index
    %c0_10 = arith.constant 0 : index
    %10 = vector.load %arg5[%c0_9, %c0_10] : memref<1x128xf32, #tpu.memory_space<vmem>>, vector<1x128xf32>
    %11 = vector.broadcast %10 : vector<1x128xf32> to vector<8x128xf32>
    %12 = arith.addf %9, %11 : vector<8x128xf32>
    %cst_11 = arith.constant 0.000000e+00 : f32
    %13 = vector.broadcast %cst_11 : f32 to vector<8x128xf32>
    %14 = arith.maximumf %12, %13 : vector<8x128xf32>
    %c0_12 = arith.constant 0 : index
    %c0_13 = arith.constant 0 : index
    %15 = vector.load %arg6[%c0_12, %c0_13] : memref<128x128xf32, #tpu.memory_space<vmem>>, vector<128x128xf32>
    %cst_14 = arith.constant dense<0.000000e+00> : vector<8x128xf32>
    %16 = tpu.matmul %14, %15, %cst_14 {dimension_numbers = #tpu.dot_dimension_numbers<[1], [0], [0], [1], [0, 0, 1, 1], [], []>} : vector<8x128xf32>, vector<128x128xf32>, vector<8x128xf32> -> vector<8x128xf32>
    %c0_15 = arith.constant 0 : index
    %c0_16 = arith.constant 0 : index
    %17 = vector.load %arg7[%c0_15, %c0_16] : memref<1x128xf32, #tpu.memory_space<vmem>>, vector<1x128xf32>
    %18 = vector.broadcast %17 : vector<1x128xf32> to vector<8x128xf32>
    %19 = arith.addf %16, %18 : vector<8x128xf32>
    %20 = math.tanh %19 : vector<8x128xf32>
    %c0_17 = arith.constant 0 : index
    %c0_18 = arith.constant 0 : index
    %21 = vector.load %arg8[%c0_17, %c0_18] : memref<8x128xf32, #tpu.memory_space<vmem>>, vector<8x128xf32>
    tpu.vector_store %arg8[%c0_17, %c0_18], %20 {strides = array<i32>} : memref<8x128xf32, #tpu.memory_space<vmem>>, vector<8x128xf32>,
    return
  }
  func.func @transform_0(%arg0: i32) -> (i32, i32) {
    %c0_i32 = arith.constant 0 : i32
    %c0_i32_0 = arith.constant 0 : i32
    return %arg0, %c0_i32 : i32, i32
  }
  func.func @transform_1(%arg0: i32) -> (i32, i32) {
    %c0_i32 = arith.constant 0 : i32
    %c0_i32_0 = arith.constant 0 : i32
    %c0_i32_1 = arith.constant 0 : i32
    return %c0_i32, %c0_i32_0 : i32, i32
  }
  func.func @transform_2(%arg0: i32) -> (i32, i32) {
    %c0_i32 = arith.constant 0 : i32
    %c0_i32_0 = arith.constant 0 : i32
    %c0_i32_1 = arith.constant 0 : i32
    return %c0_i32, %c0_i32_0 : i32, i32
  }
  func.func @transform_3(%arg0: i32) -> (i32, i32) {
    %c0_i32 = arith.constant 0 : i32
    %c0_i32_0 = arith.constant 0 : i32
    %c0_i32_1 = arith.constant 0 : i32
    return %c0_i32, %c0_i32_0 : i32, i32
  }
  func.func @transform_4(%arg0: i32) -> (i32, i32) {
    %c0_i32 = arith.constant 0 : i32
    %c0_i32_0 = arith.constant 0 : i32
    %c0_i32_1 = arith.constant 0 : i32
    return %c0_i32, %c0_i32_0 : i32, i32
  }
  func.func @transform_5(%arg0: i32) -> (i32, i32) {
    %c0_i32 = arith.constant 0 : i32
    %c0_i32_0 = arith.constant 0 : i32
    %c0_i32_1 = arith.constant 0 : i32
    return %c0_i32, %c0_i32_0 : i32, i32
  }
  func.func @transform_6(%arg0: i32) -> (i32, i32) {
    %c0_i32 = arith.constant 0 : i32
    %c0_i32_0 = arith.constant 0 : i32
    %c0_i32_1 = arith.constant 0 : i32
    return %c0_i32, %c0_i32_0 : i32, i32
  }
  func.func @transform_7(%arg0: i32) -> (i32, i32) {
    %c0_i32 = arith.constant 0 : i32
    %c0_i32_0 = arith.constant 0 : i32
    return %arg0, %c0_i32 : i32, i32
  }
}

</mosaic_0001>

<bundles_post_ra>
// kernel: tpu_custom_call.1
= control target key start
LH: loop header
LB: loop body
LE: loop exit
PB: predicated region body
PF: predicated region fallthrough
CT: control target
= control target key end

     0   :  { %12 = vsyncpa [#allocation3], 0  ;;  %s714_s0 = inlined_call_operand.hbm [shape: f32[8,8], index: 0, kind: input, shape index: {}]   ;;  %s715_s1 = inlined_call_operand.hbm [shape: f32[8,128], index: 1, kind: input, shape index: {}]   ;;  %s716_s2 = inlined_call_operand.vmem [shape: f32[1,128], index: 2, kind: input, shape index: {}]   ;;  %s717_s3 = inlined_call_operand.hbm [shape: f32[128,128], index: 3, kind: input, shape index: {}]   ;;  %s718_s4 = inlined_call_operand.vmem [shape: f32[1,128], index: 4, kind: input, shape index: {}]   ;;  %s719_s5 = inlined_call_operand.hbm [shape: f32[128,128], index: 5, kind: input, shape index: {}]   ;;  %s720_s6 = inlined_call_operand.vmem [shape: f32[1,128], index: 6, kind: input, shape index: {}]   ;;  %s721_s7 = inlined_call_operand.hbm [shape: f32[8,128], index: 7, kind: output, shape index: {}]  }
   0x1   :  { %13 = vsyncpa [#allocation6], 0 }
   0x2   :  { %14 = vsyncpa [#allocation9], 0 }
   0x3   :  { %15 = vsyncpa [#allocation4], 0  ;;  %s602_s24 = smov [#allocation5]   ;;  %s603_s26 = smov [#allocation2]  }
   0x4   :  { %s32_s25 = sshll.u32 %s602_s24, 4  ;;  %s22_s27 = sshll.u32 %s603_s26, 4  ;;  %s33_s25 = int_to_ptr.vmem [resolvable:$true] %s32_s25  ;;  %s23_s27 = int_to_ptr.vmem [resolvable:$true] %s22_s27 }
   0x5   :  { %s502_s28 = scalar_lea.vmem %s33_s25, 128  ;;  %p507_p1 = scmp.lt.s32.totalorder %s33_s25, %s33_s25 }
   0x6   :  { %p503_p0 = scmp.ne.s32.totalorder %s33_s25, %s502_s28  ;;  %p508_p2 = scmp.lt.s32.totalorder %s502_s28, %s502_s28 }
   0x8   :  { %p509_p3 = por %p508_p2, %p507_p1 }
   0xa   :  { %p510_p4 = pnand %p509_p3, %p503_p0 }
   0xc   :  { %513 = shalt.err (!%p510_p4)
}
   0xd   :  { %35 = dma.hbm_to_vmem [thread:$0]  %s715_s1, 128, %s33_s25, [#allocation6]  }
   0xe   :  { %s522_s8 = scalar_lea.vmem %s23_s27, 128  ;;  %p527_p6 = scmp.lt.s32.totalorder %s23_s27, %s23_s27 }
   0xf   :  { %p523_p5 = scmp.ne.s32.totalorder %s23_s27, %s522_s8  ;;  %p528_p7 = scmp.lt.s32.totalorder %s522_s8, %s522_s8 }
  0x11   :  { %p529_p8 = por %p528_p7, %p527_p6 }
  0x13   :  { %p530_p9 = pnand %p529_p8, %p523_p5 }
  0x15   :  { %533 = shalt.err (!%p530_p9)
}
  0x16   :  { %25 = dma.hbm_to_vmem [thread:$0]  %s714_s0, 128, %s23_s27, [#allocation3]  }
  0x17   :  { %s604_s11 = smov [#allocation7]  }
  0x18   :  { %s43_s12 = sshll.u32 %s604_s11, 4  ;;  %s44_s12 = int_to_ptr.vmem [resolvable:$true] %s43_s12 }
  0x19   :  { %s542_s13 = scalar_lea.vmem %s44_s12, 2048  ;;  %p547_p11 = scmp.lt.s32.totalorder %s44_s12, %s44_s12 }
  0x1a   :  { %p543_p10 = scmp.ne.s32.totalorder %s44_s12, %s542_s13  ;;  %p548_p12 = scmp.lt.s32.totalorder %s542_s13, %s542_s13 }
  0x1c   :  { %p549_p13 = por %p548_p12, %p547_p11 }
  0x1e   :  { %p550_p0 = pnand %p549_p13, %p543_p10 }
  0x20   :  { %553 = shalt.err (!%p550_p0)
}
  0x21   :  { %s605_s1 = smov 128   ;;  %s606_s14 = smov 8  }
  0x22   :  { %49 = dma.hbm_to_vmem [thread:$0]  %s717_s3, 2048, %s44_s12, [#allocation6], %s605_s1, %s605_s1, %s606_s14  }
  0x23   :  { %s607_s17 = smov [#allocation8]  }
  0x24   :  { %s57_s18 = sshll.u32 %s607_s17, 4  ;;  %s58_s18 = int_to_ptr.vmem [resolvable:$true] %s57_s18 }
  0x25   :  { %s562_s0 = scalar_lea.vmem %s58_s18, 2048  ;;  %p567_p2 = scmp.lt.s32.totalorder %s58_s18, %s58_s18 }
  0x26   :  { %p563_p1 = scmp.ne.s32.totalorder %s58_s18, %s562_s0  ;;  %p568_p3 = scmp.lt.s32.totalorder %s562_s0, %s562_s0 }
  0x28   :  { %p569_p4 = por %p568_p3, %p567_p2 }
  0x2a   :  { %p570_p5 = pnand %p569_p4, %p563_p1 }
  0x2c   :  { %573 = shalt.err (!%p570_p5)
}
  0x2d   :  { %63 = dma.hbm_to_vmem [thread:$0]  %s719_s5, 2048, %s58_s18, [#allocation9], %s605_s1, %s605_s1, %s606_s14  }
  0x2e   :  { %594 = dma.done.wait [#allocation3], 128  }
  0x2f   :  { %595 = vsyncadd [#allocation3], 4294967168 }
  0x30   :  { %596 = dma.done.wait [#allocation6], 2176  }
  0x31   :  { %597 = vsyncadd [#allocation6], 4294965120 }
  0x32   :  { %598 = dma.done.wait [#allocation9], 2048  }
  0x33   :  { %599 = vsyncadd [#allocation9], 4294965248  ;;  %v608_v0 = vmov 0.0   ;;  %vm609_vm0 = vmmov 0   ;;  %vm87_vm1 = vcmask 64512   ;;  %v79_v1 = vld [vmem:[#allocation5] sm:$0xff] }
  0x34   :  { %408 = vmatprep.subr.mxu0 %v608_v0  ;;  %410 = vmatprep.mubr.msk.f32.mxu0 %vm609_vm0, %v608_v0  ;;  %v78_v2 = vld [vmem:[#allocation2] sm:$0xff]  ;;  %v177_v3 = vld [vmem:[#allocation7 + $0x78] sm:$0xff]  ;;  %v175_v5 = vld [vmem:[#allocation7 + $0x68] sm:$0xff]  ;;  %s610_s24 = smov [#allocation10]  }
  0x35   :  { %413 = vmatprep.subr.mxu1 %v608_v0  ;;  %445 = vmatprep.mubr.msk.f32.mxu1 %vm609_vm0, %v608_v0  ;;  %v176_v4 = vld [vmem:[#allocation7 + $0x70] sm:$0xff]  ;;  %v174_v6 = vld [vmem:[#allocation7 + $0x60] sm:$0xff]  ;;  %v173_v7 = vld [vmem:[#allocation7 + $0x58] sm:$0xff]  ;;  %s357_s25 = sshll.u32 %s610_s24, 4  ;;  %s358_s25 = int_to_ptr.vmem [resolvable:$true] %s357_s25 }
  0x36   :  { %409 = vmatpush3.msra.mxu0 %v79_v1  ;;  %414 = vmatpush3.msra.mxu1 %v177_v3  ;;  %v172_v8 = vld [vmem:[#allocation7 + $0x50] sm:$0xff]  ;;  %v171_v9 = vld [vmem:[#allocation7 + $0x48] sm:$0xff]  ;;  %v170_v10 = vld [vmem:[#allocation7 + $0x40] sm:$0xff]  ;;  %s574_s26 = scalar_lea.vmem %s358_s25, 128  ;;  %p579_p7 = scmp.lt.s32.totalorder %s358_s25, %s358_s25 }
  0x37   :  { %411 = vmatmul.mubr.msk.f32.vlgmr.msra.gmra.mxu0 %vm87_vm1, %v78_v2  ;;  %415 = vmatprep.subr.mxu1 %v608_v0  ;;  %v169_v11 = vld [vmem:[#allocation7 + $0x38] sm:$0xff]  ;;  %v168_v12 = vld [vmem:[#allocation7 + $0x30] sm:$0xff]  ;;  %v167_v13 = vld [vmem:[#allocation7 + $0x28] sm:$0xff]  ;;  %p575_p6 = scmp.ne.s32.totalorder %s358_s25, %s574_s26  ;;  %p580_p8 = scmp.lt.s32.totalorder %s574_s26, %s574_s26 }
  0x38   :  { %416 = vmatpush3.msra.mxu1 %v176_v4  ;;  %448 = vmatprep.subr.mxu0 %v608_v0  ;;  %v166_v14 = vld [vmem:[#allocation7 + $0x20] sm:$0xff]  ;;  %v165_v15 = vld [vmem:[#allocation7 + $0x18] sm:$0xff]  ;;  %v164_v16 = vld [vmem:[#allocation7 + $0x10] sm:$0xff] }
  0x39   :  { %417 = vmatprep.subr.mxu1 %v608_v0  ;;  %480 = vmatprep.mubr.msk.f32.mxu0 %vm609_vm0, %v608_v0  ;;  %v163_v17 = vld [vmem:[#allocation7 + $0x8] sm:$0xff]  ;;  %v162_v18 = vld [vmem:[#allocation7] sm:$0xff]  ;;  %v271_v19 = vld [vmem:[#allocation8 + $0x78] sm:$0xff]  ;;  %p581_p9 = por %p580_p8, %p579_p7 }
  0x3a   :  { %418 = vmatpush3.msra.mxu1 %v175_v5  ;;  %v270_v20 = vld [vmem:[#allocation8 + $0x70] sm:$0xff]  ;;  %449 = vmatpush3.msra.mxu0 %v271_v19  ;;  %v269_v21 = vld [vmem:[#allocation8 + $0x68] sm:$0xff]  ;;  %v268_v22 = vld [vmem:[#allocation8 + $0x60] sm:$0xff] }
  0x3b   :  { %419 = vmatprep.subr.mxu1 %v608_v0  ;;  %450 = vmatprep.subr.mxu0 %v608_v0  ;;  %v267_v23 = vld [vmem:[#allocation8 + $0x58] sm:$0xff]  ;;  %v266_v24 = vld [vmem:[#allocation8 + $0x50] sm:$0xff]  ;;  %v265_v25 = vld [vmem:[#allocation8 + $0x48] sm:$0xff]  ;;  %p582_p10 = pnand %p581_p9, %p575_p6 }
  0x3c   :  { %420 = vmatpush3.msra.mxu1 %v174_v6  ;;  %451 = vmatpush3.msra.mxu0 %v270_v20  ;;  %v264_v26 = vld [vmem:[#allocation8 + $0x40] sm:$0xff]  ;;  %v263_v27 = vld [vmem:[#allocation8 + $0x38] sm:$0xff]  ;;  %v262_v28 = vld [vmem:[#allocation8 + $0x30] sm:$0xff] }
  0x3d   :  { %421 = vmatprep.subr.mxu1 %v608_v0  ;;  %452 = vmatprep.subr.mxu0 %v608_v0  ;;  %v261_v29 = vld [vmem:[#allocation8 + $0x28] sm:$0xff]  ;;  %v260_v30 = vld [vmem:[#allocation8 + $0x20] sm:$0xff]  ;;  %v259_v31 = vld [vmem:[#allocation8 + $0x18] sm:$0xff] }
  0x3e   :  { %422 = vmatpush3.msra.mxu1 %v173_v7  ;;  %453 = vmatpush3.msra.mxu0 %v269_v21  ;;  %v368_v32 = vld [vmem:[%s716_s2] ss:$0 sm:$0xff]  ;;  %v257_v38 = vld [vmem:[#allocation8 + $0x8] sm:$0xff]  ;;  %v256_v39 = vld [vmem:[#allocation8] sm:$0xff] }
  0x3f   :  { %423 = vmatprep.subr.mxu1 %v608_v0  ;;  %454 = vmatprep.subr.mxu0 %v608_v0  ;;  %v258_v37 = vld [vmem:[#allocation8 + $0x10] sm:$0xff] }
  0x40   :  { %424 = vmatpush3.msra.mxu1 %v172_v8  ;;  %455 = vmatpush3.msra.mxu0 %v268_v22  ;;  %v370_v40 = vld [vmem:[%s718_s4] ss:$0 sm:$0xff] }
  0x41   :  { %425 = vmatprep.subr.mxu1 %v608_v0  ;;  %456 = vmatprep.subr.mxu0 %v608_v0  ;;  %v371_v45 = vld [vmem:[%s720_s6] ss:$0 sm:$0xff] }
  0x42   :  { %426 = vmatpush3.msra.mxu1 %v171_v9  ;;  %457 = vmatpush3.msra.mxu0 %v267_v23 }
  0x43   :  { %427 = vmatprep.subr.mxu1 %v608_v0  ;;  %458 = vmatprep.subr.mxu0 %v608_v0 }
  0x44   :  { %428 = vmatpush3.msra.mxu1 %v170_v10  ;;  %459 = vmatpush3.msra.mxu0 %v266_v24 }
  0x45   :  { %429 = vmatprep.subr.mxu1 %v608_v0  ;;  %460 = vmatprep.subr.mxu0 %v608_v0 }
  0x46   :  { %430 = vmatpush3.msra.mxu1 %v169_v11  ;;  %461 = vmatpush3.msra.mxu0 %v265_v25 }
  0x47   :  { %431 = vmatprep.subr.mxu1 %v608_v0  ;;  %462 = vmatprep.subr.mxu0 %v608_v0 }
  0x48   :  { %432 = vmatpush3.msra.mxu1 %v168_v12  ;;  %463 = vmatpush3.msra.mxu0 %v264_v26 }
  0x49   :  { %433 = vmatprep.subr.mxu1 %v608_v0  ;;  %464 = vmatprep.subr.mxu0 %v608_v0 }
  0x4a   :  { %434 = vmatpush3.msra.mxu1 %v167_v13  ;;  %465 = vmatpush3.msra.mxu0 %v263_v27 }
  0x4b   :  { %435 = vmatprep.subr.mxu1 %v608_v0  ;;  %466 = vmatprep.subr.mxu0 %v608_v0 }
  0x4c   :  { %436 = vmatpush3.msra.mxu1 %v166_v14  ;;  %467 = vmatpush3.msra.mxu0 %v262_v28 }
  0x4d   :  { %437 = vmatprep.subr.mxu1 %v608_v0  ;;  %468 = vmatprep.subr.mxu0 %v608_v0 }
  0x4e   :  { %438 = vmatpush3.msra.mxu1 %v165_v15  ;;  %469 = vmatpush3.msra.mxu0 %v261_v29 }
  0x4f   :  { %439 = vmatprep.subr.mxu1 %v608_v0  ;;  %470 = vmatprep.subr.mxu0 %v608_v0 }
  0x50   :  { %440 = vmatpush3.msra.mxu1 %v164_v16  ;;  %471 = vmatpush3.msra.mxu0 %v260_v30 }
  0x51   :  { %441 = vmatprep.subr.mxu1 %v608_v0  ;;  %472 = vmatprep.subr.mxu0 %v608_v0 }
  0x52   :  { %442 = vmatpush3.msra.mxu1 %v163_v17  ;;  %473 = vmatpush3.msra.mxu0 %v259_v31 }
  0x53   :  { %443 = vmatprep.subr.mxu1 %v608_v0  ;;  %474 = vmatprep.subr.mxu0 %v608_v0 }
  0x54   :  { %444 = vmatpush3.msra.mxu1 %v162_v18  ;;  %475 = vmatpush3.msra.mxu0 %v258_v37 }
  0x55   :  { %476 = vmatprep.subr.mxu0 %v608_v0 }
  0x56   :  { %477 = vmatpush3.msra.mxu0 %v257_v38 }
  0x57   :  { %478 = vmatprep.subr.mxu0 %v608_v0 }
  0x58   :  { %479 = vmatpush3.msra.mxu0 %v256_v39 }
  0xf7   :  { %v157_v33 = vpop.f32.mrf.mxu0 }
  0xf8   :  { %v158_v34 = vadd.f32 %v368_v32, %v157_v33 }
  0xf9   :  { %v412_v35 = vpop.f32.mrf.mxu0 }
  0xfa   :  { %v161_v36 = vmax.f32 %v158_v34, 0.0 }
  0xfc   :  { %446 = vmatmul.mubr.f32.vlgmr.msra.gmra.mxu1 %v161_v36 }
 0x1bc   :  { %v251_v41 = vpop.f32.mrf.mxu1 }
 0x1bd   :  { %v252_v42 = vadd.f32 %v370_v40, %v251_v41 }
 0x1be   :  { %v447_v43 = vpop.f32.mrf.mxu1 }
 0x1bf   :  { %v255_v44 = vmax.f32 %v252_v42, 0.0 }
 0x1c1   :  { %481 = vmatmul.mubr.f32.vlgmr.msra.gmra.mxu0 %v255_v44 }
 0x281   :  { %v345_v46 = vpop.f32.mrf.mxu0 }
 0x282   :  { %v346_v47 = vadd.f32 %v371_v45, %v345_v46 }
 0x283   :  { %v482_v48 = vpop.f32.mrf.mxu0 }
 0x284   :  { %492 = vtanh.f32 %v346_v47 }
 0x291   :  { %v493_v49 = vpop.eup %492 }
 0x292   :  { %350 = vst [vmem:[#allocation10] sm:$0xff] %v493_v49 }
 0x293   :  { %585 = shalt.err (!%p582_p10)
}
 0x294   :  { %360 = dma.vmem_to_hbm [thread:$0]  %s358_s25, 128, %s721_s7, [#allocation4]  }
 0x295   :  { %600 = dma.done.wait [#allocation4], 128  }
 0x296   :  { %601 = vsyncadd [#allocation4], 4294967168 }
 0x297   :  { %364 = vsyncpa [#allocation3], 1 }
 0x298   :  { %365 = vsyncpa [#allocation6], 1 }
 0x299   :  { %366 = vsyncpa [#allocation9], 1 }
 0x29a   :  { %367 = vsyncpa [#allocation4], 1 }

</bundles_post_ra>
